<compile_context>
chip_gen: v7x
topology: tpu7x:2x2x1
jax: 0.10.0
libtpu: 0.0.40
codegen_flags: <defaults>
</compile_context>

<pallas_src>
import functools

import jax
import jax.numpy as jnp
from jax import lax
from jax.experimental import pallas as pl
from jax.experimental.pallas import tpu as pltpu

LANES = 128
TARGET_BLOCK_BYTES = 4 * 1024 * 1024   # per input, per pipeline buffer
MIN_SPLIT_BYTES = 512 * 1024           # below this, one block (no split)
VMEM_LIMIT_BYTES = 40 * 1024 * 1024    # < 64 MiB (v7x physical), << v5e/v6e


def _round_up(x: int, m: int) -> int:
    return ((x + m - 1) // m) * m


def _vector_mse_kernel(pred_ref, y_ref, out_ref, *, c, last_block,
                       valid_rows_last):
    """Write this block's partial of sum((y-pred)^2 + c*|pred|) to out_ref[0,0]."""
    p = pred_ref[...].astype(jnp.float32)
    d = y_ref[...].astype(jnp.float32) - p
    # Fused single accumulation term: loss * N = sum(d^2) + c * sum(|p|).
    contrib = d * d + c * jnp.abs(p)

    if valid_rows_last is None:
        # No ragged block anywhere: plain 5-op/elem memory-bound path.
        out_ref[0, 0] = jnp.sum(contrib)
    else:
        # Only the last block extends past the array; gate the mask so all
        # full blocks stay on the cheap path.
        @pl.when(pl.program_id(0) != last_block)
        def _():
            out_ref[0, 0] = jnp.sum(contrib)

        @pl.when(pl.program_id(0) == last_block)
        def _():
            # Block-local row ids compared against the scalar valid-row count
            # (select, NOT multiply: OOB VMEM rows may hold NaN/Inf garbage).
            row_ids = lax.broadcasted_iota(jnp.int32, contrib.shape, 0)
            out_ref[0, 0] = jnp.sum(
                jnp.where(row_ids < valid_rows_last, contrib, 0.0))


def vector_mse(pred: jax.Array, y: jax.Array, c: float) -> jax.Array:
    """loss = mean((y - pred)^2) + c * mean(|pred|), computed in a Pallas kernel."""
    assert pred.shape == y.shape, "pred and y must share a shape"
    n_elems = pred.size
    c = float(c)

    pred_f = pred.reshape(-1)
    y_f = y.reshape(-1)

    rows = n_elems // LANES          # lane-aligned main body
    tail = n_elems - rows * LANES    # < 128 leftover elements (handled in JAX)

    if rows == 0:
        # Degenerate tiny input (< 128 elements): nothing to tile.
        p = pred_f.astype(jnp.float32)
        yy = y_f.astype(jnp.float32)
        d = yy - p
        return (jnp.sum(d * d) + c * jnp.sum(jnp.abs(p))) / jnp.float32(n_elems)

    main = rows * LANES
    pred2d = pred_f[:main].reshape(rows, LANES)
    y2d = y_f[:main].reshape(rows, LANES)

    # ---- tile sizing (byte based) -------------------------------------
    itemsize = jnp.dtype(pred.dtype).itemsize
    # Sublane pack: 8 rows for 4-byte, 16 for 2-byte, 32 for 1-byte dtypes.
    pack = max(8, 32 // max(itemsize, 1))
    max_tm = max(pack, (TARGET_BLOCK_BYTES // (LANES * itemsize)) // pack * pack)

    row_bytes = LANES * itemsize
    if rows * row_bytes <= MIN_SPLIT_BYTES:
        # Tiny problem: one block (block == full array dim is always legal).
        tm = rows
    else:
        # Force >= 4 blocks so the DMA pipeline overlaps and megacore (v7x)
        # can shard the "parallel" axis across both TensorCores.
        tm = min(max_tm, _round_up(pl.cdiv(rows, 4), pack))
        tm = min(tm, rows)

    num_blocks = pl.cdiv(rows, tm)
    ragged = (rows % tm) != 0
    valid_rows_last = (rows - (num_blocks - 1) * tm) if ragged else None

    kernel = functools.partial(
        _vector_mse_kernel,
        c=c,
        last_block=num_blocks - 1,
        valid_rows_last=valid_rows_last,
    )

    partials = pl.pallas_call(
        kernel,
        out_shape=jax.ShapeDtypeStruct((num_blocks, 1), jnp.float32),
        grid_spec=pltpu.PrefetchScalarGridSpec(
            num_scalar_prefetch=0,
            grid=(num_blocks,),
            in_specs=[
                pl.BlockSpec((tm, LANES), lambda i: (i, 0)),
                pl.BlockSpec((tm, LANES), lambda i: (i, 0)),
            ],
            out_specs=pl.BlockSpec(
                (1, 1), lambda i: (i, 0), memory_space=pltpu.SMEM
            ),
        ),
        compiler_params=pltpu.CompilerParams(
            # Blocks are independent (per-block partials, no carried
            # accumulator) -> parallel axis; megacore chips can shard it.
            dimension_semantics=("parallel",),
            vmem_limit_bytes=VMEM_LIMIT_BYTES,
        ),
        cost_estimate=pl.CostEstimate(
            flops=6 * main,
            transcendentals=0,
            bytes_accessed=2 * main * itemsize + 4 * num_blocks,
        ),
    )(pred2d, y2d)

    total = jnp.sum(partials)

    if tail != 0:
        # <128 leftover elements: cheaper to fold in with plain JAX than to
        # jnp.pad (which would copy both full inputs in HBM).
        p_t = pred_f[main:].astype(jnp.float32)
        y_t = y_f[main:].astype(jnp.float32)
        d_t = y_t - p_t
        total = total + jnp.sum(d_t * d_t + c * jnp.abs(p_t))

    return total / jnp.float32(n_elems)


def _check(shape, c, key):
    k1, k2 = jax.random.split(key)
    pred = jax.random.normal(k1, shape, dtype=jnp.float32)
    y = jax.random.normal(k2, shape, dtype=jnp.float32)
    loss = vector_mse(pred, y, c)
    jax.block_until_ready(loss)
    ref = jnp.mean((y - pred) ** 2) + c * jnp.mean(jnp.abs(pred))
    assert jnp.allclose(loss, ref, rtol=1e-5, atol=1e-6), (shape, loss, ref)
    return loss


if __name__ == "__main__":
    key = jax.random.PRNGKey(0)
    c = 0.1

    # Primary small NCHW example (lane-aligned, single block).
    _check((2, 4, 16, 16), c, key)
    # Non-lane-aligned element count -> exercises the plain-JAX tail path.
    _check((3, 5, 37, 41), c, jax.random.fold_in(key, 1))
    # Larger input -> exercises the multi-block + ragged-last-block path.
    _check((4, 8, 64, 65), c, jax.random.fold_in(key, 2))

    print("KERNEL_OK")
</pallas_src>

<mosaic_0001>
module attributes {stable_mosaic.version = 11 : i64} {
  func.func @_vector_mse_kernel(%arg0: i32, %arg1: memref<16x128xf32, #tpu.memory_space<vmem>>, %arg2: memref<16x128xf32, #tpu.memory_space<vmem>>, %arg3: memref<1x1xf32, #tpu.memory_space<smem>>) attributes {dimension_semantics = [#tpu.dimension_semantics<parallel>], iteration_bounds = array<i64: 1>, scalar_prefetch = 0 : i64, scratch_operands = 0 : i64, tpu.core_type = #tpu.core_type<tc>, window_params = [{transform_indices = @transform_0, window_bounds = array<i64: 16, 128>}, {transform_indices = @transform_1, window_bounds = array<i64: 16, 128>}, {transform_indices = @transform_2, window_bounds = array<i64: 1, 1>}]} {
    %c0 = arith.constant 0 : index
    %c0_0 = arith.constant 0 : index
    %0 = vector.load %arg1[%c0, %c0_0] : memref<16x128xf32, #tpu.memory_space<vmem>>, vector<16x128xf32>
    %c0_1 = arith.constant 0 : index
    %c0_2 = arith.constant 0 : index
    %1 = vector.load %arg2[%c0_1, %c0_2] : memref<16x128xf32, #tpu.memory_space<vmem>>, vector<16x128xf32>
    %2 = arith.subf %1, %0 : vector<16x128xf32>
    %3 = arith.mulf %2, %2 : vector<16x128xf32>
    %4 = math.absf %0 : vector<16x128xf32>
    %cst = arith.constant 1.000000e-01 : f32
    %5 = vector.broadcast %cst : f32 to vector<16x128xf32>
    %6 = arith.mulf %5, %4 : vector<16x128xf32>
    %7 = arith.addf %3, %6 : vector<16x128xf32>
    %8 = vector.shape_cast %7 : vector<16x128xf32> to vector<1x16x128xf32>
    %cst_3 = arith.constant dense<0.000000e+00> : vector<1xf32>
    %9 = vector.multi_reduction <add>, %8, %cst_3 [1, 2] : vector<1x16x128xf32> to vector<1xf32>
    %10 = vector.shape_cast %9 : vector<1xf32> to vector<1x1x1xf32>
    %11 = vector.extract %10[0, 0, 0] : f32 from vector<1x1x1xf32>
    %c0_4 = arith.constant 0 : index
    %c0_5 = arith.constant 0 : index
    %12 = memref.load %arg3[%c0_4, %c0_5] : memref<1x1xf32, #tpu.memory_space<smem>>
    memref.store %11, %arg3[%c0_4, %c0_5] : memref<1x1xf32, #tpu.memory_space<smem>>
    return
  }
  func.func @transform_0(%arg0: i32) -> (i32, i32) {
    %c0_i32 = arith.constant 0 : i32
    %c0_i32_0 = arith.constant 0 : i32
    return %arg0, %c0_i32 : i32, i32
  }
  func.func @transform_1(%arg0: i32) -> (i32, i32) {
    %c0_i32 = arith.constant 0 : i32
    %c0_i32_0 = arith.constant 0 : i32
    return %arg0, %c0_i32 : i32, i32
  }
  func.func @transform_2(%arg0: i32) -> (i32, i32) {
    %c0_i32 = arith.constant 0 : i32
    %c0_i32_0 = arith.constant 0 : i32
    return %arg0, %c0_i32 : i32, i32
  }
}

</mosaic_0001>

<bundles_post_ra>
// kernel: tpu_custom_call.1
= control target key start
LH: loop header
LB: loop body
LE: loop exit
PB: predicated region body
PF: predicated region fallthrough
CT: control target
= control target key end

     0   :  { %7 = vsyncpa [#allocation3], 0  ;;  %s204_s0 = inlined_call_operand.hbm [shape: f32[16,128], index: 0, kind: input, shape index: {}]   ;;  %s205_s1 = inlined_call_operand.hbm [shape: f32[16,128], index: 1, kind: input, shape index: {}]   ;;  %s206_s2 = inlined_call_operand.hbm [shape: f32[1,1], index: 2, kind: output, shape index: {}]  }
   0x1   :  { %8 = vsyncpa [#allocation6], 0 }
   0x2   :  { %9 = vsyncpa [#allocation4], 0  ;;  %s148_s9 = smov [#allocation2]   ;;  %s88_s13 = scalar_lea.hbm %s204_s0, 256 }
   0x3   :  { %s15_s10 = sshll.u32 %s148_s9, 4  ;;  %p89_p0 = scmp.ne.s32.totalorder %s204_s0, %s88_s13  ;;  %s16_s10 = int_to_ptr.vmem [resolvable:$true] %s15_s10 }
   0x4   :  { %p92_p1 = scmp.lt.u32.totalorder %s88_s13, %s204_s0 }
   0x6   :  { %p94_p2 = pnand %p92_p1, %p89_p0 }
   0x8   :  { %97 = shalt.err (!%p94_p2)
}
   0x9   :  { %s98_s18 = scalar_lea.vmem %s16_s10, 256  ;;  %p103_p4 = scmp.lt.s32.totalorder %s16_s10, %s16_s10 }
   0xa   :  { %p99_p3 = scmp.ne.s32.totalorder %s16_s10, %s98_s18  ;;  %p104_p5 = scmp.lt.s32.totalorder %s98_s18, %s98_s18 }
   0xc   :  { %p105_p6 = por %p104_p5, %p103_p4 }
   0xe   :  { %p106_p7 = pnand %p105_p6, %p99_p3 }
  0x10   :  { %109 = shalt.err (!%p106_p7)
}
  0x11   :  { %s149_s19 = smov 128   ;;  %s150_s20 = smov 8  }
  0x12   :  { %21 = dma.hbm_to_vmem [thread:$0]  %s204_s0, 256, %s16_s10, [#allocation3], %s149_s19, %s149_s19, %s150_s20  }
  0x13   :  { %s151_s23 = smov [#allocation5]   ;;  %s110_s27 = scalar_lea.hbm %s205_s1, 256 }
  0x14   :  { %s27_s24 = sshll.u32 %s151_s23, 4  ;;  %p111_p8 = scmp.ne.s32.totalorder %s205_s1, %s110_s27  ;;  %s28_s24 = int_to_ptr.vmem [resolvable:$true] %s27_s24 }
  0x15   :  { %p114_p9 = scmp.lt.u32.totalorder %s110_s27, %s205_s1 }
  0x17   :  { %p116_p10 = pnand %p114_p9, %p111_p8 }
  0x19   :  { %119 = shalt.err (!%p116_p10)
}
  0x1a   :  { %s120_s4 = scalar_lea.vmem %s28_s24, 256  ;;  %p125_p12 = scmp.lt.s32.totalorder %s28_s24, %s28_s24 }
  0x1b   :  { %p121_p11 = scmp.ne.s32.totalorder %s28_s24, %s120_s4  ;;  %p126_p13 = scmp.lt.s32.totalorder %s120_s4, %s120_s4 }
  0x1d   :  { %p127_p0 = por %p126_p13, %p125_p12 }
  0x1f   :  { %p128_p1 = pnand %p127_p0, %p121_p11 }
  0x21   :  { %131 = shalt.err (!%p128_p1)
}
  0x22   :  { %33 = dma.hbm_to_vmem [thread:$0]  %s205_s1, 256, %s28_s24, [#allocation6], %s149_s19, %s149_s19, %s150_s20  }
  0x23   :  { %142 = dma.done.wait [#allocation3], 256  }
  0x24   :  { %143 = vsyncadd [#allocation3], 4294967040 }
  0x25   :  { %144 = dma.done.wait [#allocation6], 256  }
  0x26   :  { %145 = vsyncadd [#allocation6], 4294967040  ;;  %v40_v0 = vld [vmem:[#allocation2] sm:$0xff]  ;;  %v41_v1 = vld [vmem:[#allocation2 + $0x8] sm:$0xff]  ;;  %s132_s8 = scalar_lea.hbm %s206_s2, 16 }
  0x27   :  { %v42_v2 = vld [vmem:[#allocation5] sm:$0xff]  ;;  %v43_v3 = vld [vmem:[#allocation5 + $0x8] sm:$0xff]  ;;  %v48_v5 = vand.u32 2147483647, %v40_v0  ;;  %v49_v6 = vand.u32 2147483647, %v41_v1  ;;  %p133_p2 = scmp.ne.s32.totalorder %s206_s2, %s132_s8  ;;  %p136_p3 = scmp.lt.u32.totalorder %s132_s8, %s206_s2 }
  0x28   :  { %v44_v4 = vsub.f32 %v42_v2, %v40_v0  ;;  %v45_v7 = vsub.f32 %v43_v3, %v41_v1 }
  0x29   :  { %v50_v9 = vmul.f32 0.1, %v48_v5  ;;  %v51_v10 = vmul.f32 0.1, %v49_v6  ;;  %p138_p4 = pnand %p136_p3, %p133_p2 }
  0x2a   :  { %v46_v8 = vmul.f32 %v44_v4, %v44_v4  ;;  %v47_v11 = vmul.f32 %v45_v7, %v45_v7 }
  0x2c   :  { %v52_v12 = vadd.f32 %v50_v9, %v46_v8  ;;  %v53_v13 = vadd.f32 %v51_v10, %v47_v11 }
  0x2e   :  { %v54_v14 = vadd.f32 %v53_v13, %v52_v12 }
  0x30   :  { %55 = vadd.xlane.f32.xlu0 %v54_v14 }
  0xbd   :  { %v56_v15 = vpop.xlane.xlu0 %55 }
  0xbe   :  { %v57_v16 = vrot.slane %v56_v15, 4 }
  0xc0   :  { %v58_v17 = vadd.f32 %v57_v16, %v56_v15 }
  0xc2   :  { %v59_v18 = vrot.slane %v58_v17, 2 }
  0xc4   :  { %v60_v19 = vadd.f32 %v59_v18, %v58_v17 }
  0xc6   :  { %v61_v20 = vrot.slane %v60_v19, 1 }
  0xc8   :  { %v62_v21 = vadd.f32 %v61_v20, %v60_v19 }
  0xca   :  { %81 = vpush %v62_v21 }
  0xfb   :  { %s82_s1 = spop %81 }
  0xfc   :  { %65 = sst [smem:[#allocation7]] %s82_s1 }
  0xfd   :  { %141 = shalt.err (!%p138_p4)
}
  0xfe   :  { %s152_s13 = smov [#allocation7]  }
  0xff   :  { %73 = dma.smem_to_hbm %s152_s13, 16, %s206_s2, [#allocation4]  }
 0x100   :  { %146 = dma.done.wait [#allocation4], 16  }
 0x101   :  { %147 = vsyncadd [#allocation4], 4294967280 }
 0x102   :  { %77 = sfence }
 0x103   :  { %78 = vsyncpa [#allocation3], 1 }
 0x104   :  { %79 = vsyncpa [#allocation6], 1 }
 0x105   :  { %80 = vsyncpa [#allocation4], 1 }

</bundles_post_ra>
